<compile_context>
chip_gen: v6e
topology: v6e:2x2x1
jax: 0.10.0
libtpu: 0.0.40
codegen_flags: <defaults>
</compile_context>

<pallas_src>
import functools

import jax
import jax.numpy as jnp
from jax import lax
from jax.experimental import pallas as pl
from jax.experimental.pallas import tpu as pltpu


def _exp_eig_kernel(u_ref, s_ref, o_ref, *, sub: int, mxu_dtype):
    """Reconstruct exp(A) = U diag(exp(|s|)) U^T for a tile of `bt` matrices.

    u_ref: (bt, Np, Np) eigenvectors; s_ref: (bt, 1, Np) eigenvalues (f32);
    o_ref: (bt, Np, Np) output.
    """
    bt = u_ref.shape[0]
    n_sub = bt // sub

    def reconstruct(u_blk, s_blk):
        # exp of the (abs'ed) spectrum in f32 on the EUP; half-scale so LHS == RHS.
        half = jnp.exp(0.5 * jnp.abs(s_blk.astype(jnp.float32)))      # (c, 1, Np)
        # Column scale in f32 (accuracy, avoids bf16 VALU emulation on v5e),
        # cast once just before the MXU.
        v = (u_blk.astype(jnp.float32) * half).astype(mxu_dtype)       # (c, Np, Np)
        # out[b, i, j] = sum_k V[b, i, k] * V[b, j, k] == V @ V^T (no transpose pass).
        return lax.dot_general(
            v, v,
            dimension_numbers=(((2,), (2,)), ((0,), (0,))),
            preferred_element_type=jnp.float32,
        )

    if n_sub <= 1:
        o_ref[...] = reconstruct(u_ref[...], s_ref[...]).astype(o_ref.dtype)
    else:
        # Stream sub-chunks: bounds live ranges (bf16/f32 V and f32 out never live for
        # the whole block) and spreads stores across the step.
        def body(c, carry):
            i0 = pl.multiple_of(c * sub, sub)
            out = reconstruct(u_ref[pl.ds(i0, sub), :, :],
                              s_ref[pl.ds(i0, sub), :, :])
            o_ref[pl.ds(i0, sub), :, :] = out.astype(o_ref.dtype)
            return carry

        lax.fori_loop(0, n_sub, body, 0)


def _largest_divisor_leq(n: int, cap: int) -> int:
    cap = max(1, min(n, cap))
    for d in range(cap, 0, -1):
        if n % d == 0:
            return d
    return 1


def _pick_batch_tile(B: int, Np: int, itemsize: int) -> int:
    # Target ~2-4 MiB of (input U block + output block) per grid step: past the DMA
    # amortization knee, small enough to keep VMEM pressure / unrolled-batched-matmul
    # compile blowup low.
    per_mat = 2 * Np * Np * itemsize
    bt = max(1, (3 * 1024 * 1024) // per_mat)
    # Keep the grid >= 4 steps so DMA/compute overlap and v7x dual-TC sharding exist.
    bt = max(1, min(bt, max(1, B // 4)))
    # Prefer an even number of grid steps (even split across v7x's 2 TensorCores),
    # but never shrink the tile by more than ~2x for it.
    if bt > 1 and pl.cdiv(B, bt) % 2 == 1:
        for cand in range(bt - 1, max(bt // 2, 1) - 1, -1):
            if pl.cdiv(B, cand) % 2 == 0:
                bt = cand
                break
    return bt


def _vmem_limit_bytes() -> int:
    cap = 64 * 1024 * 1024  # conservative default (v7x physical VMEM)
    try:
        info = pltpu.get_tpu_info()
        cap = int(getattr(info, "vmem_capacity_bytes", cap))
    except Exception:
        pass
    # <= half of physical: 32 MiB on v7x (64 MiB part), 64 MiB on v5e/v6e (128 MiB).
    return int(min(max(cap // 2, 16 * 1024 * 1024), 64 * 1024 * 1024))


def spd_exp_eig(x: jnp.ndarray, *, prefer_bf16_matmul: bool = False) -> jnp.ndarray:
    """Forward of SPDExpEig: matrix exponential of batched symmetric (SPD) matrices."""
    B, N, M = x.shape
    assert N == M, "input must be batched square (SPD) matrices"

    # TODO(synk): the eigendecomposition has no Pallas primitive; it stays in XLA.
    # Using |s| in the kernel makes the eigh path match the svd-based reference
    # exactly for symmetric inputs.
    s, u = jnp.linalg.eigh(x)                      # u: (B, N, N), s: (B, N)
    s3 = s.reshape(B, 1, N).astype(jnp.float32)    # lane axis last

    # Lane-dense padding: for N just below 128, pad to 128 so output stores are full
    # 128-lane vst's and MXU passes are not mostly padding.  Zero eigenvector
    # columns/rows contribute nothing to V V^T, so the top-left NxN block is exact.
    Np = 128 if 80 <= N < 128 else N
    if Np != N:
        u = jnp.pad(u, ((0, 0), (0, Np - N), (0, Np - N)))
        s3 = jnp.pad(s3, ((0, 0), (0, 0), (0, Np - N)))

    itemsize = jnp.dtype(x.dtype).itemsize
    bt = _pick_batch_tile(B, Np, itemsize)
    grid = pl.cdiv(B, bt)
    Bp = grid * bt
    if Bp != B:
        u = jnp.pad(u, ((0, Bp - B), (0, 0), (0, 0)))
        s3 = jnp.pad(s3, ((0, Bp - B), (0, 0), (0, 0)))

    # In-kernel sub-chunk size (live-range bounding); must divide bt.
    sub = _largest_divisor_leq(bt, 8)

    # bf16 MXU operands only once the matmul is compute-visible (opt-in).
    mxu_dtype = x.dtype
    if prefer_bf16_matmul and x.dtype == jnp.float32 and Np >= 512:
        mxu_dtype = jnp.bfloat16

    cost = pl.CostEstimate(
        flops=2 * Bp * Np * Np * Np + 2 * Bp * Np * Np,   # Gram matmul + column scale
        transcendentals=Bp * Np,                          # exp of eigenvalues
        bytes_accessed=2 * Bp * Np * Np * itemsize + Bp * Np * 4,
    )

    kernel = functools.partial(_exp_eig_kernel, sub=sub, mxu_dtype=mxu_dtype)

    out = pl.pallas_call(
        kernel,
        out_shape=jax.ShapeDtypeStruct((Bp, Np, Np), x.dtype),
        grid_spec=pltpu.PrefetchScalarGridSpec(
            num_scalar_prefetch=0,
            grid=(grid,),
            in_specs=[
                pl.BlockSpec((bt, Np, Np), lambda b: (b, 0, 0)),
                pl.BlockSpec((bt, 1, Np), lambda b: (b, 0, 0)),
            ],
            out_specs=pl.BlockSpec((bt, Np, Np), lambda b: (b, 0, 0)),
        ),
        compiler_params=pltpu.CompilerParams(
            dimension_semantics=("parallel",),
            vmem_limit_bytes=_vmem_limit_bytes(),
        ),
        cost_estimate=cost,
    )(u, s3)

    if Bp != B or Np != N:
        out = out[:B, :N, :N]
    return out


def _reference(x):
    # Same math as the PyTorch module (svd-based), in plain JAX.
    u, s, _ = jnp.linalg.svd(x)
    return u @ (jnp.exp(s)[..., None] * jnp.swapaxes(u, -1, -2))


if __name__ == "__main__":
    key = jax.random.PRNGKey(0)

    def make_spd(k, B, N, dtype=jnp.float32):
        a = jax.random.normal(k, (B, N, N), dtype=dtype)
        return a @ jnp.swapaxes(a, -1, -2) / N + 1e-3 * jnp.eye(N, dtype=dtype)[None]

    k0, k1 = jax.random.split(key)
    # (B=4, N=16): grid of 4 single-matrix steps (direct in-kernel path).
    # (B=64, N=16): bt=16, grid=4, exercises the fori_loop sub-chunk path.
    for kk, B, N in ((k0, 4, 16), (k1, 64, 16)):
        x = make_spd(kk, B, N)
        out = jax.block_until_ready(spd_exp_eig(x))
        ref = _reference(x)
        err = float(jnp.max(jnp.abs(out - ref)))
        scale = float(jnp.max(jnp.abs(ref)))
        assert err < 1e-3 * max(scale, 1.0), (
            f"mismatch vs reference at B={B}, N={N}: {err} (scale {scale})")

    print("KERNEL_OK")
</pallas_src>

<mosaic_0001>
module attributes {stable_mosaic.version = 11 : i64} {
  func.func @_exp_eig_kernel(%arg0: i32, %arg1: memref<1x16x16xf32, #tpu.memory_space<vmem>>, %arg2: memref<1x1x16xf32, #tpu.memory_space<vmem>>, %arg3: memref<1x16x16xf32, #tpu.memory_space<vmem>>) attributes {dimension_semantics = [#tpu.dimension_semantics<parallel>], iteration_bounds = array<i64: 4>, scalar_prefetch = 0 : i64, scratch_operands = 0 : i64, tpu.core_type = #tpu.core_type<tc>, window_params = [{transform_indices = @transform_0, window_bounds = array<i64: 1, 16, 16>}, {transform_indices = @transform_1, window_bounds = array<i64: 1, 1, 16>}, {transform_indices = @transform_2, window_bounds = array<i64: 1, 16, 16>}]} {
    %c0 = arith.constant 0 : index
    %c0_0 = arith.constant 0 : index
    %c0_1 = arith.constant 0 : index
    %0 = vector.load %arg1[%c0, %c0_0, %c0_1] : memref<1x16x16xf32, #tpu.memory_space<vmem>>, vector<1x16x16xf32>
    %c0_2 = arith.constant 0 : index
    %c0_3 = arith.constant 0 : index
    %c0_4 = arith.constant 0 : index
    %1 = vector.load %arg2[%c0_2, %c0_3, %c0_4] : memref<1x1x16xf32, #tpu.memory_space<vmem>>, vector<1x1x16xf32>
    %2 = math.absf %1 : vector<1x1x16xf32>
    %cst = arith.constant 5.000000e-01 : f32
    %3 = vector.broadcast %cst : f32 to vector<1x1x16xf32>
    %4 = arith.mulf %3, %2 : vector<1x1x16xf32>
    %5 = math.exp %4 : vector<1x1x16xf32>
    %6 = vector.broadcast %5 : vector<1x1x16xf32> to vector<1x16x16xf32>
    %7 = arith.mulf %0, %6 : vector<1x16x16xf32>
    %cst_5 = arith.constant dense<0.000000e+00> : vector<1x16x16xf32>
    %8 = tpu.matmul %7, %7, %cst_5 {dimension_numbers = #tpu.dot_dimension_numbers<[2], [2], [1], [1], [0, 0, 0, 1, 1, 1], [0], [0]>} : vector<1x16x16xf32>, vector<1x16x16xf32>, vector<1x16x16xf32> -> vector<1x16x16xf32>
    %c0_6 = arith.constant 0 : index
    %c0_7 = arith.constant 0 : index
    %c0_8 = arith.constant 0 : index
    %9 = vector.load %arg3[%c0_6, %c0_7, %c0_8] : memref<1x16x16xf32, #tpu.memory_space<vmem>>, vector<1x16x16xf32>
    tpu.vector_store %arg3[%c0_6, %c0_7, %c0_8], %8 {strides = array<i32>} : memref<1x16x16xf32, #tpu.memory_space<vmem>>, vector<1x16x16xf32>,
    return
  }
  func.func @transform_0(%arg0: i32) -> (i32, i32, i32) {
    %c0_i32 = arith.constant 0 : i32
    %c0_i32_0 = arith.constant 0 : i32
    %c0_i32_1 = arith.constant 0 : i32
    return %arg0, %c0_i32, %c0_i32_0 : i32, i32, i32
  }
  func.func @transform_1(%arg0: i32) -> (i32, i32, i32) {
    %c0_i32 = arith.constant 0 : i32
    %c0_i32_0 = arith.constant 0 : i32
    %c0_i32_1 = arith.constant 0 : i32
    return %arg0, %c0_i32, %c0_i32_0 : i32, i32, i32
  }
  func.func @transform_2(%arg0: i32) -> (i32, i32, i32) {
    %c0_i32 = arith.constant 0 : i32
    %c0_i32_0 = arith.constant 0 : i32
    %c0_i32_1 = arith.constant 0 : i32
    return %arg0, %c0_i32, %c0_i32_0 : i32, i32, i32
  }
}

</mosaic_0001>

<bundles_post_ra>
// kernel: tpu_custom_call.1
= control target key start
LH: loop header
LB: loop body
LE: loop exit
PB: predicated region body
PF: predicated region fallthrough
CT: control target
= control target key end

     0   :  { %7 = vsyncpa [#allocation3], 0  ;;  %s846_s0 = inlined_call_operand.hbm [shape: f32[4,16,16], index: 0, kind: input, shape index: {}]   ;;  %s847_s1 = inlined_call_operand.hbm [shape: f32[4,1,16], index: 1, kind: input, shape index: {}]   ;;  %s848_s2 = inlined_call_operand.hbm [shape: f32[4,16,16], index: 2, kind: output, shape index: {}]  }
   0x1   :  { %9 = vsyncpa [#allocation3 + $0x1], 0 }
   0x2   :  { %10 = vsyncpa [#allocation6], 0 }
   0x3   :  { %12 = vsyncpa [#allocation6 + $0x1], 0 }
   0x4   :  { %13 = vsyncpa [#allocation4], 0 }
   0x5   :  { %15 = vsyncpa [#allocation4 + $0x1], 0  ;;  %s639_s9 = smov 0   ;;  %s641_s10 = smov 0  }
   0x6   :  { %s643_s11 = smov 0   ;;  %s645_s12 = smov 0  }
   0x7 LB: > { %s660_s13 = sadd.s32 4294967295, %s615_s12   ;;  %s402_s14 = sadd.s32 4294967294, %s615_s12   ;;  %s615_s12 = sphi %s645_s12, %s864_s12   ;;  %s611_s11 = sphi %s643_s11, %s863_s11   ;;  %s607_s10 = sphi %s641_s10, %s862_s10   ;;  %s603_s9 = sphi %s639_s9, %s861_s9  }
   0x8   : > { %s664_s15 = sadd.s32 1, %s615_s12   ;;  %s28_s16 = sadd.s32 1, %s611_s11 }
   0x9   : > { %s25_s17 = ssub.s32 %s615_s12, %s664_s15  ;;  %p35_p0 = scmp.ne.s32.totalorder %s611_s11, %s607_s10 }
   0xa   : > { %p26_p1 = scmp.eq.s32.totalorder %s25_s17, 0  ;;  %p36_p2 = scmp.eq.s32.totalorder %s615_s12, 0 }
   0xb   : > { %p41_p3 = scmp.ne.s32.totalorder %s607_s10, %s603_s9  ;;  %p42_p4 = scmp.eq.s32.totalorder %s660_s13, 0 }
   0xc   : > { %s676_s18 = scalar_select %p26_p1, %s611_s11, %s28_s16  }
   0xd   : > { %p678_p5 = por %p36_p2, %p35_p0  ;;  %p682_p6 = por %p42_p4, %p41_p3 }
   0xe   : > { %p91_p7 = scmp.eq.s32.totalorder %s660_s13, 3  ;;  %p97_p8 = scmp.eq.s32.totalorder %s402_s14, 3 }
   0xf   : > { %s852_s20 = scalar_select %p682_p6, 1, 0 }
  0x10   : > { %p451_p9 = scmp.lt.s32.totalorder %s615_s12, 4  ;;  %p688_p10 = por %p91_p7, %p35_p0 }
  0x11   : > { %p692_p11 = por %p97_p8, %p41_p3  ;;  %s697_s23 = sand.u32 1, %s611_s11  }
  0x12   : > { %s853_s21 = scalar_select %p688_p10, 1, 0 }
  0x13   : > { %s854_s22 = scalar_select %p692_p11, 1, 0 }
  0x14   : > { %s421_s24 = sshll.u32 %s615_s12, 8  ;;  %s405_s25 = sshll.u32 %s697_s23, 4 }
  0x15   : > { %s704_s28 = scalar_lea.hbm %s846_s0, %s421_s24  ;;  %s121_s29 = scalar_lea.vmem [#allocation2], %s405_s25 }
  0x16   : > { %s128_s30 = sshll.u32 %s121_s29, 4  ;;  %p708_p12 = pnand %p451_p9, %p678_p5  ;;  %s712_s30 = int_to_ptr.vmem [resolvable:$true] %s128_s30 }
  0x17   : > { %s118_s4 = scalar_lea.sflag [#allocation3], %s697_s23  ;;  %s491_s5 = scalar_lea.hbm %s704_s28, 256 }
  0x18   : > { %p492_p13 = scmp.ne.s32.totalorder %s704_s28, %s491_s5  ;;  %p493_p0 = pneg %p708_p12 }
  0x19   : > { %s496_s8 = scalar_lea.hbm %s846_s0, 1024  ;;  %p497_p3 = scmp.lt.s32.totalorder %s704_s28, %s846_s0 }
  0x1a   : > { %p494_p1 = pnand %p493_p0, %p492_p13  ;;  %p498_p4 = scmp.lt.s32.totalorder %s496_s8, %s491_s5 }
  0x1c   : > { %p495_p2 = pneg %p494_p1  ;;  %p499_p5 = por %p498_p4, %p497_p3 }
  0x1e   : > { %p500_p7 = pnand %p499_p5, %p495_p2 }
  0x20   : > { %503 = shalt.err (!%p500_p7)
}
  0x21   : > { %s504_s17 = scalar_lea.vmem %s712_s30, 256  ;;  %s617_s19 = smov [#allocation2]  }
  0x22   : > { %p505_p8 = scmp.ne.s32.totalorder %s712_s30, %s504_s17  ;;  %s509_s24 = sshll.u32 %s617_s19, 4  ;;  %s510_s24 = int_to_ptr.vmem [resolvable:$false] %s509_s24 }
  0x23   : > { %s511_s25 = scalar_lea.vmem %s510_s24, 512  ;;  %p512_p1 = scmp.lt.s32.totalorder %s712_s30, %s510_s24 }
  0x24   : > { %p507_p9 = pnand %p505_p8, %p493_p0  ;;  %p513_p11 = scmp.lt.s32.totalorder %s511_s25, %s504_s17 }
  0x26   : > { %p508_p13 = pneg %p507_p9  ;;  %p514_p10 = por %p513_p11, %p512_p1 }
  0x28   : > { %p515_p3 = pnand %p514_p10, %p508_p13 }
  0x2a   : > { %518 = shalt.err (!%p515_p3)
}
  0x2b   : > { %s618_s26 = smov 128   ;;  %s619_s27 = smov 8  }
  0x2c   : > { %443 = dma.hbm_to_vmem [thread:$0]  (!%p708_p12), %s704_s28, 256, %s712_s30, %s118_s4, %s618_s26, %s618_s26, %s619_s27  }
  0x2d   : > { %p409_p2 = scmp.ge.s32.totalorder %s615_s12, 1  ;;  %p153_p4 = scmp.lt.s32.totalorder %s615_s12, 5 }
  0x2e   : > { %s408_s5 = sshll.u32 %s615_s12, 4  ;;  %s141_s14 = scalar_lea.vmem [#allocation5], %s697_s23 }
  0x2f   : > { %p743_p11 = pnand %p409_p2, %p153_p4  ;;  %s751_s8 = scalar_lea.hbm %s847_s1, %s408_s5 }
  0x30   : > { %s148_s16 = sshll.u32 %s141_s14, 4  ;;  %s139_s17 = scalar_lea.sflag [#allocation6], %s697_s23  ;;  %s149_s16 = int_to_ptr.vmem [resolvable:$true] %s148_s16 }
  0x31   : > { %s856_s29 = scalar_select %p743_p11, 1, 0 }
  0x32   : > { %s519_s28 = scalar_lea.hbm %s751_s8, 16  ;;  %s524_s19 = scalar_lea.hbm %s847_s1, 64 }
  0x33   : > { %p520_p10 = scmp.ne.s32.totalorder %s751_s8, %s519_s28  ;;  %p525_p8 = scmp.lt.s32.totalorder %s751_s8, %s847_s1 }
  0x34   : > { %p526_p9 = scmp.lt.s32.totalorder %s524_s19, %s519_s28 }
  0x35   : > { %p522_p5 = pnand %p520_p10, %p493_p0 }
  0x36   : > { %p527_p13 = por %p526_p9, %p525_p8 }
  0x37   : > { %p523_p7 = pneg %p522_p5 }
  0x39   : > { %p528_p1 = pnand %p527_p13, %p523_p7 }
  0x3b   : > { %531 = shalt.err (!%p528_p1)
}
  0x3c   : > { %s532_s26 = scalar_lea.vmem %s149_s16, 16  ;;  %s620_s23 = smov [#allocation5]  }
  0x3d   : > { %p533_p3 = scmp.ne.s32.totalorder %s149_s16, %s532_s26  ;;  %s537_s27 = sshll.u32 %s620_s23, 4  ;;  %s538_s27 = int_to_ptr.vmem [resolvable:$false] %s537_s27 }
  0x3e   : > { %s539_s5 = scalar_lea.vmem %s538_s27, 32  ;;  %p540_p10 = scmp.lt.s32.totalorder %s149_s16, %s538_s27 }
  0x3f   : > { %p535_p2 = pnand %p533_p3, %p493_p0  ;;  %p541_p5 = scmp.lt.s32.totalorder %s539_s5, %s532_s26 }
  0x41   : > { %p536_p4 = pneg %p535_p2  ;;  %p542_p6 = por %p541_p5, %p540_p10 }
  0x43   : > { %p543_p11 = pnand %p542_p6, %p536_p4 }
  0x45   : > { %546 = shalt.err (!%p543_p11)
}
  0x46   : > { %446 = dma.hbm_to_vmem [thread:$0]  (!%p708_p12), %s751_s8, 16, %s149_s16, %s139_s17  }
  0x47   : > { %p857_p7 = scmp.ne.s32.totalorder %s856_s29, 0 }
  0x48   : > { %s776_s6 = sand.u32 (!%p857_p7), 1, %s607_s10   ;;  %p858_p0 = scmp.ne.s32.totalorder (!%p857_p7), %s852_s20, 0 }
  0x49   : > { %157 = sbr.rel (%p857_p7) target bundleno = 323 (0x143), region = 28  ;;  %s410_s7 = sshll.u32 (!%p857_p7), %s776_s6, 4 }
  0x4a   : > { %s160_s14 = scalar_lea.sflag (!%p857_p7), [#allocation3], %s776_s6  ;;  %s163_s28 = scalar_lea.vmem (!%p857_p7), [#allocation2], %s410_s7 }
  0x4e   : > { %590 = dma.done.wait (%p858_p0), %s160_s14, 256  }
  0x4f   : > { %592 = vsyncadd (%p858_p0), %s160_s14, 4294967040  ;;  %s169_s3 = scalar_lea.sflag [#allocation6], %s776_s6  ;;  %s171_s29 = scalar_lea.vmem [#allocation5], %s776_s6 }
  0x50   : > { %594 = dma.done.wait (%p858_p0), %s169_s3, 16  }
  0x51   : > { %596 = vsyncadd (%p858_p0), %s169_s3, 4294967280  ;;  %v198_v0 = vld [vmem:[%s171_s29] sm:$0x1]  ;;  %v204_v4 = vlaneseq  ;;  %v197_v8 = vld [vmem:[%s163_s28 + $0x8] sm:$0xff]  ;;  %vm211_vm0 = vcmask 130048   ;;  %s195_s20 = scalar_lea.vmem [#allocation7], %s410_s7 }
  0x52   : > { %v199_v1 = vand.u32 2147483647, %v198_v0  ;;  %v196_v9 = vld [vmem:[%s163_s28] sm:$0xff]  ;;  %s309_s8 = sshll.u32 %s195_s20, 4  ;;  %s422_s16 = sshll.u32 %s660_s13, 8  ;;  %s797_s8 = int_to_ptr.vmem [resolvable:$true] %s309_s8 }
  0x53   : > { %v205_v5 = vshrl.u32 %v204_v4, 7  ;;  %s802_s4 = scalar_lea.hbm %s848_s2, %s422_s16  ;;  %s296_s19 = scalar_lea.sflag [#allocation4], %s776_s6 }
  0x54   : > { %v200_v2 = vmul.f32 0.5, %v199_v1  ;;  %s547_s24 = scalar_lea.vmem %s797_s8, 256  ;;  %p859_p12 = scmp.ne.s32.totalorder %s853_s21, 0 }
  0x55   : > { %v206_v6 = vsub.s32 0, %v205_v5  ;;  %p548_p6 = scmp.ne.s32.totalorder %s797_s8, %s547_s24  ;;  %s621_s13 = smov [#allocation7]  }
  0x56   : > { %v201_v3 = vmul.f32 1.442695, %v200_v2  ;;  %s551_s25 = sshll.u32 %s621_s13, 4  ;;  %s552_s25 = int_to_ptr.vmem [resolvable:$false] %s551_s25 }
  0x57   : > { %p549_p11 = pnand %p548_p6, %p859_p12  ;;  %s553_s26 = scalar_lea.vmem %s552_s25, 512 }
  0x58   : > { %489 = vpow2.f32 %v201_v3  ;;  %p554_p9 = scmp.lt.s32.totalorder %s797_s8, %s552_s25  ;;  %p555_p13 = scmp.lt.s32.totalorder %s553_s26, %s547_s24 }
  0x59   : > { %p550_p8 = pneg %p549_p11 }
  0x5a   : > { %p556_p1 = por %p555_p13, %p554_p9 }
  0x5c   : > { %p557_p3 = pnand %p556_p1, %p550_p8 }
  0x65   : > { %v490_v7 = vpop.eup %489 }
  0x66   : > { %v207_v10 = vrot.slane %v490_v7, %v206_v6 }
  0x68   : > { %v210_v11 = vmul.f32 %v207_v10, %v197_v8  ;;  %v209_v12 = vmul.f32 %v207_v10, %v196_v9 }
  0x6a   : > { %427 = vmatprep.subr.msk.mxu0 %vm211_vm0, %v210_v11  ;;  %431 = vmatprep.mubr.msk.f32.mxu0 %vm211_vm0, %v209_v12 }
  0x6b   : > { %428 = vmatpush3.xpose.msk.msra.mxu0 %vm211_vm0, %v210_v11 }
  0x6c   : > { %429 = vmatprep.subr.msk.mxu0 %vm211_vm0, %v209_v12 }
  0x6f   : > { %430 = vmatpush3.xpose.msk.msra.mxu0 %vm211_vm0, %v209_v12 }
  0x72   : > { %432 = vmatmul.mubr.msk.f32.vlgmr.msra.gmra.mxu0 %vm211_vm0, %v210_v11 }
 0x132   : > { %v433_v13 = vpop.f32.mrf.mxu0 }
 0x133   : > { %294 = vst.msk [vmem:[%s195_s20 + $0x8] sm:$0xff] %vm211_vm0, %v433_v13 }
 0x134   : > { %v284_v14 = vpop.f32.mrf.mxu0 }
 0x135   : > { %293 = vst.msk [vmem:[%s195_s20] sm:$0xff] %vm211_vm0, %v284_v14 }
 0x136   : > { %560 = shalt.err (!%p557_p3)
}
 0x137   : > { %s561_s23 = scalar_lea.hbm %s802_s4, 256  ;;  %s565_s7 = scalar_lea.hbm %s848_s2, 1024 }
 0x138   : > { %p562_p2 = scmp.ne.s32.totalorder %s802_s4, %s561_s23  ;;  %p566_p5 = scmp.lt.s32.totalorder %s802_s4, %s848_s2 }
 0x139   : > { %p567_p7 = scmp.lt.s32.totalorder %s565_s7, %s561_s23 }
 0x13a   : > { %p563_p4 = pnand %p562_p2, %p859_p12 }
 0x13b   : > { %p568_p0 = por %p567_p7, %p566_p5 }
 0x13c   : > { %p564_p10 = pneg %p563_p4 }
 0x13e   : > { %p569_p6 = pnand %p568_p0, %p564_p10 }
 0x140   : > { %572 = shalt.err (!%p569_p6)
}
 0x141   : > { %s622_s3 = smov 128   ;;  %s623_s29 = smov 8  }
 0x142   : > { %438 = dma.vmem_to_hbm [thread:$0]  (%p859_p12), %s797_s8, 256, %s802_s4, %s296_s19, %s622_s3, %s622_s3, %s623_s29  }
 0x143 PF: > { %p452_p11 = scmp.ge.s32.totalorder %s615_s12, 2  ;;  %s324_s20 = sand.u32 1, %s603_s9  }
 0x144   : > { %p860_p8 = scmp.ne.s32.totalorder %s854_s22, 0  ;;  %s325_s16 = scalar_lea.sflag [#allocation4], %s324_s20 }
 0x146   : > { %p448_p9 = pnand %p452_p11, %p860_p8 }
 0x148   : > { %p449_p13 = pneg %p448_p9 }
 0x14a   : > { %598 = dma.done.wait (%p449_p13), %s325_s16, 256  }
 0x14b   : > { %600 = vsyncadd (%p449_p13), %s325_s16, 4294967040  ;;  %p18_p1 = scmp.ge.s32.totalorder %s664_s15, 6   ;;  %s861_s9 = smov %s607_s10 }
 0x14c   : > { %s862_s10 = smov %s611_s11  ;;  %s863_s11 = smov %s676_s18 }
 0x14d   : > { %s864_s12 = smov %s664_s15  ;;  %20 = sbr.rel (!%p18_p1) target bundleno = 7 (0x7), region = 86 }
 0x152   :  { %330 = vsyncpa [#allocation3], 1 }
 0x153   :  { %332 = vsyncpa [#allocation3 + $0x1], 1 }
 0x154   :  { %333 = vsyncpa [#allocation6], 1 }
 0x155   :  { %335 = vsyncpa [#allocation6 + $0x1], 1 }
 0x156   :  { %336 = vsyncpa [#allocation4], 1 }
 0x157   :  { %338 = vsyncpa [#allocation4 + $0x1], 1 }

</bundles_post_ra>
